<compile_context>
chip_gen: v6e
topology: v6e:2x2x1
jax: 0.10.0
libtpu: 0.0.40
codegen_flags: <defaults>
</compile_context>

<pallas_src>
import functools

import jax
import jax.numpy as jnp
from jax.experimental import pallas as pl
from jax.experimental.pallas import tpu as pltpu

_LANES = 128


def _polarnet_kernel(ra_ref, w1r_ref, w1a_ref, b1_ref, w2_ref, b2_ref, out_ref,
                     *, compute_dtype):
    """One lane-tile of the forward pass.

    ra_ref : (2, T)  row 0 = r, row 1 = theta   (batch on lanes)
    w1r_ref: (H, 1)  first-layer weight column for r
    w1a_ref: (H, 1)  first-layer weight column for theta
    b1_ref : (H, 1)  first-layer bias
    w2_ref : (H, 1)  second-layer weight (column vector)
    b2_ref : (1, 1)  second-layer bias
    out_ref: (1, T)  sigmoid output, lane-dense
    """
    ra = ra_ref[...]                                   # (2, T) f32
    r = ra[0:1, :].astype(compute_dtype)               # (1, T)
    a = ra[1:2, :].astype(compute_dtype)               # (1, T)

    w1r = w1r_ref[...].astype(compute_dtype)           # (H, 1)
    w1a = w1a_ref[...].astype(compute_dtype)           # (H, 1)
    b1 = b1_ref[...].astype(compute_dtype)             # (H, 1)

    # Hidden layer: two VPU broadcast-FMAs + tanh (EUP); dense (H, T) vregs.
    h = jnp.tanh(w1r * r + w1a * a + b1)               # (H, T)
    h = h.astype(jnp.float32)

    # Output head: elementwise multiply + reduce over H (sublane axis), f32.
    logits = jnp.sum(h * w2_ref[...], axis=0, keepdims=True) + b2_ref[...]
    out_ref[...] = jax.nn.sigmoid(logits).astype(out_ref.dtype)   # (1, T)


def polarnet_forward(x, w1, b1, w2, b2, *, n_tile=8192,
                     compute_dtype=jnp.float32):
    """x: (N, 2) f32; PyTorch nn.Linear params: w1 (H,2), b1 (H,), w2 (1,H), b2 (1,)."""
    x = x.astype(jnp.float32)
    n = x.shape[0]
    hdim = w1.shape[0]

    # --- preprocessing glue: mirrors the module's detached-numpy xy_to_ra ---
    r = jnp.sqrt(x[:, 0] * x[:, 0] + x[:, 1] * x[:, 1])
    a = jnp.arctan2(x[:, 1], x[:, 0])
    ra_t = jnp.stack([r, a], axis=0)                    # (2, N) batch-on-lanes

    # --- lane-dense tiling: pad batch to a multiple of the tile width ---
    n_up = ((n + _LANES - 1) // _LANES) * _LANES
    tile = max(_LANES, min((n_tile // _LANES) * _LANES, n_up))
    num_tiles = (n_up + tile - 1) // tile
    n_pad = num_tiles * tile
    ra_t = jnp.pad(ra_t, ((0, 0), (0, n_pad - n)))      # (2, n_pad)

    # parameter reshapes (glue): column vectors so every op broadcasts on lanes
    w1_r = w1[:, 0:1]                                   # (H, 1)
    w1_a = w1[:, 1:2]                                   # (H, 1)
    b1_c = b1.reshape(hdim, 1)                          # (H, 1)
    w2_c = w2.reshape(hdim, 1)                          # (H, 1)
    b2_c = b2.reshape(1, 1)                             # (1, 1)

    kernel = functools.partial(_polarnet_kernel, compute_dtype=compute_dtype)
    param_spec = pl.BlockSpec((hdim, 1), lambda i: (0, 0))

    out_t = pl.pallas_call(
        kernel,
        out_shape=jax.ShapeDtypeStruct((1, n_pad), jnp.float32),
        grid=(num_tiles,),
        in_specs=[
            pl.BlockSpec((2, tile), lambda i: (0, i)),  # ra tile (pipelined)
            param_spec,                                 # w1[:, 0]
            param_spec,                                 # w1[:, 1]
            param_spec,                                 # b1
            param_spec,                                 # w2
            pl.BlockSpec((1, 1), lambda i: (0, 0)),     # b2
        ],
        out_specs=pl.BlockSpec((1, tile), lambda i: (0, i)),
        compiler_params=pltpu.CompilerParams(
            dimension_semantics=("parallel",)),
    )(ra_t, w1_r, w1_a, b1_c, w2_c, b2_c)

    return out_t[0, :n].reshape(n, 1)


def reference_forward(x, w1, b1, w2, b2):
    """Pure-JAX reference matching the PyTorch module."""
    r = jnp.sqrt(x[:, 0] ** 2 + x[:, 1] ** 2)
    a = jnp.arctan2(x[:, 1], x[:, 0])
    ra = jnp.stack([r, a], axis=-1)
    hdn = jnp.tanh(ra @ w1.T + b1)
    return jax.nn.sigmoid(hdn @ w2.T + b2)


if __name__ == "__main__":
    num_hid = 32
    batch = 8

    key = jax.random.PRNGKey(0)
    kx, k1, k2, k3, k4 = jax.random.split(key, 5)

    # deterministic inputs and parameters (PyTorch Linear-style uniform init)
    x = jax.random.normal(kx, (batch, 2), dtype=jnp.float32)

    lim1 = 1.0 / jnp.sqrt(2.0)
    w1 = jax.random.uniform(k1, (num_hid, 2), jnp.float32, -lim1, lim1)
    b1 = jax.random.uniform(k2, (num_hid,), jnp.float32, -lim1, lim1)

    lim2 = 1.0 / jnp.sqrt(float(num_hid))
    w2 = jax.random.uniform(k3, (1, num_hid), jnp.float32, -lim2, lim2)
    b2 = jax.random.uniform(k4, (1,), jnp.float32, -lim2, lim2)

    # small-batch check (single tile)
    out = jax.block_until_ready(polarnet_forward(x, w1, b1, w2, b2))
    ref = reference_forward(x, w1, b1, w2, b2)
    assert out.shape == (batch, 1), out.shape
    assert jnp.allclose(out, ref, atol=1e-5, rtol=1e-5), (out, ref)

    # multi-tile check: grid > 1, pipelined tiles, padded (non-multiple) tail
    x_big = jax.random.normal(kx, (300, 2), dtype=jnp.float32)
    out_big = jax.block_until_ready(
        polarnet_forward(x_big, w1, b1, w2, b2, n_tile=128))
    ref_big = reference_forward(x_big, w1, b1, w2, b2)
    assert out_big.shape == (300, 1), out_big.shape
    assert jnp.allclose(out_big, ref_big, atol=1e-5, rtol=1e-5)

    print("KERNEL_OK")
</pallas_src>

<mosaic_0001>
module attributes {stable_mosaic.version = 11 : i64} {
  func.func @_polarnet_kernel(%arg0: i32, %arg1: memref<2x128xf32, #tpu.memory_space<vmem>>, %arg2: memref<32x1xf32, #tpu.memory_space<vmem>>, %arg3: memref<32x1xf32, #tpu.memory_space<vmem>>, %arg4: memref<32x1xf32, #tpu.memory_space<vmem>>, %arg5: memref<32x1xf32, #tpu.memory_space<vmem>>, %arg6: memref<1x1xf32, #tpu.memory_space<vmem>>, %arg7: memref<1x128xf32, #tpu.memory_space<vmem>>) attributes {dimension_semantics = [#tpu.dimension_semantics<parallel>], iteration_bounds = array<i64: 1>, scalar_prefetch = 0 : i64, scratch_operands = 0 : i64, tpu.core_type = #tpu.core_type<tc>, window_params = [{transform_indices = @transform_0, window_bounds = array<i64: 2, 128>}, {pipeline_mode = #tpu.pipeline_mode<synchronous>, transform_indices = @transform_1, window_bounds = array<i64: 32, 1>}, {pipeline_mode = #tpu.pipeline_mode<synchronous>, transform_indices = @transform_2, window_bounds = array<i64: 32, 1>}, {pipeline_mode = #tpu.pipeline_mode<synchronous>, transform_indices = @transform_3, window_bounds = array<i64: 32, 1>}, {pipeline_mode = #tpu.pipeline_mode<synchronous>, transform_indices = @transform_4, window_bounds = array<i64: 32, 1>}, {pipeline_mode = #tpu.pipeline_mode<synchronous>, transform_indices = @transform_5, window_bounds = array<i64: 1, 1>}, {transform_indices = @transform_6, window_bounds = array<i64: 1, 128>}]} {
    %c0 = arith.constant 0 : index
    %c0_0 = arith.constant 0 : index
    %0 = vector.load %arg1[%c0, %c0_0] : memref<2x128xf32, #tpu.memory_space<vmem>>, vector<2x128xf32>
    %1 = vector.extract_strided_slice %0 {offsets = [0, 0], sizes = [1, 128], strides = [1, 1]} : vector<2x128xf32> to vector<1x128xf32>
    %2 = vector.extract_strided_slice %0 {offsets = [1, 0], sizes = [1, 128], strides = [1, 1]} : vector<2x128xf32> to vector<1x128xf32>
    %c0_1 = arith.constant 0 : index
    %c0_2 = arith.constant 0 : index
    %3 = vector.load %arg2[%c0_1, %c0_2] : memref<32x1xf32, #tpu.memory_space<vmem>>, vector<32x1xf32>
    %c0_3 = arith.constant 0 : index
    %c0_4 = arith.constant 0 : index
    %4 = vector.load %arg3[%c0_3, %c0_4] : memref<32x1xf32, #tpu.memory_space<vmem>>, vector<32x1xf32>
    %c0_5 = arith.constant 0 : index
    %c0_6 = arith.constant 0 : index
    %5 = vector.load %arg4[%c0_5, %c0_6] : memref<32x1xf32, #tpu.memory_space<vmem>>, vector<32x1xf32>
    %6 = vector.broadcast %3 : vector<32x1xf32> to vector<32x128xf32>
    %7 = vector.broadcast %1 : vector<1x128xf32> to vector<32x128xf32>
    %8 = arith.mulf %6, %7 : vector<32x128xf32>
    %9 = vector.broadcast %4 : vector<32x1xf32> to vector<32x128xf32>
    %10 = vector.broadcast %2 : vector<1x128xf32> to vector<32x128xf32>
    %11 = arith.mulf %9, %10 : vector<32x128xf32>
    %12 = arith.addf %8, %11 : vector<32x128xf32>
    %13 = vector.broadcast %5 : vector<32x1xf32> to vector<32x128xf32>
    %14 = arith.addf %12, %13 : vector<32x128xf32>
    %15 = math.tanh %14 : vector<32x128xf32>
    %c0_7 = arith.constant 0 : index
    %c0_8 = arith.constant 0 : index
    %16 = vector.load %arg5[%c0_7, %c0_8] : memref<32x1xf32, #tpu.memory_space<vmem>>, vector<32x1xf32>
    %17 = vector.broadcast %16 : vector<32x1xf32> to vector<32x128xf32>
    %18 = arith.mulf %15, %17 : vector<32x128xf32>
    %cst = arith.constant dense<0.000000e+00> : vector<128xf32>
    %19 = vector.multi_reduction <add>, %18, %cst [0] : vector<32x128xf32> to vector<128xf32>
    %20 = vector.shape_cast %19 : vector<128xf32> to vector<1x128xf32>
    %c0_9 = arith.constant 0 : index
    %c0_10 = arith.constant 0 : index
    %21 = vector.load %arg6[%c0_9, %c0_10] : memref<1x1xf32, #tpu.memory_space<vmem>>, vector<1x1xf32>
    %22 = vector.broadcast %21 : vector<1x1xf32> to vector<1x128xf32>
    %23 = arith.addf %20, %22 : vector<1x128xf32>
    %24 = arith.negf %23 : vector<1x128xf32>
    %25 = math.exp %24 : vector<1x128xf32>
    %cst_11 = arith.constant 1.000000e+00 : f32
    %26 = vector.broadcast %cst_11 : f32 to vector<1x128xf32>
    %27 = arith.addf %26, %25 : vector<1x128xf32>
    %28 = arith.divf %26, %27 : vector<1x128xf32>
    %c0_12 = arith.constant 0 : index
    %c0_13 = arith.constant 0 : index
    %29 = vector.load %arg7[%c0_12, %c0_13] : memref<1x128xf32, #tpu.memory_space<vmem>>, vector<1x128xf32>
    tpu.vector_store %arg7[%c0_12, %c0_13], %28 {strides = array<i32>} : memref<1x128xf32, #tpu.memory_space<vmem>>, vector<1x128xf32>,
    return
  }
  func.func @transform_0(%arg0: i32) -> (i32, i32) {
    %c0_i32 = arith.constant 0 : i32
    %c0_i32_0 = arith.constant 0 : i32
    return %c0_i32, %arg0 : i32, i32
  }
  func.func @transform_1(%arg0: i32) -> (i32, i32) {
    %c0_i32 = arith.constant 0 : i32
    %c0_i32_0 = arith.constant 0 : i32
    %c0_i32_1 = arith.constant 0 : i32
    return %c0_i32, %c0_i32_0 : i32, i32
  }
  func.func @transform_2(%arg0: i32) -> (i32, i32) {
    %c0_i32 = arith.constant 0 : i32
    %c0_i32_0 = arith.constant 0 : i32
    %c0_i32_1 = arith.constant 0 : i32
    return %c0_i32, %c0_i32_0 : i32, i32
  }
  func.func @transform_3(%arg0: i32) -> (i32, i32) {
    %c0_i32 = arith.constant 0 : i32
    %c0_i32_0 = arith.constant 0 : i32
    %c0_i32_1 = arith.constant 0 : i32
    return %c0_i32, %c0_i32_0 : i32, i32
  }
  func.func @transform_4(%arg0: i32) -> (i32, i32) {
    %c0_i32 = arith.constant 0 : i32
    %c0_i32_0 = arith.constant 0 : i32
    %c0_i32_1 = arith.constant 0 : i32
    return %c0_i32, %c0_i32_0 : i32, i32
  }
  func.func @transform_5(%arg0: i32) -> (i32, i32) {
    %c0_i32 = arith.constant 0 : i32
    %c0_i32_0 = arith.constant 0 : i32
    %c0_i32_1 = arith.constant 0 : i32
    return %c0_i32, %c0_i32_0 : i32, i32
  }
  func.func @transform_6(%arg0: i32) -> (i32, i32) {
    %c0_i32 = arith.constant 0 : i32
    %c0_i32_0 = arith.constant 0 : i32
    return %c0_i32, %arg0 : i32, i32
  }
}

</mosaic_0001>

<bundles_post_ra>
// kernel: tpu_custom_call.1
= control target key start
LH: loop header
LB: loop body
LE: loop exit
PB: predicated region body
PF: predicated region fallthrough
CT: control target
= control target key end

     0   :  { %s329_s0 = inlined_call_operand.vmem [shape: f32[2,128], index: 0, kind: input, shape index: {}]   ;;  %s330_s1 = inlined_call_operand.vmem [shape: f32[32,1], index: 1, kind: input, shape index: {}]   ;;  %s331_s2 = inlined_call_operand.vmem [shape: f32[32,1], index: 2, kind: input, shape index: {}]   ;;  %s332_s3 = inlined_call_operand.vmem [shape: f32[32,1], index: 3, kind: input, shape index: {}]   ;;  %s333_s4 = inlined_call_operand.vmem [shape: f32[32,1], index: 4, kind: input, shape index: {}]   ;;  %s334_s5 = inlined_call_operand.<no memory space> [shape: f32[1,1], index: 5, kind: input, shape index: {}]   ;;  %s335_s6 = inlined_call_operand.hbm [shape: f32[1,128], index: 6, kind: output, shape index: {}]  }
   0x1   :  { %v11_v0 = vstv %s334_s5 }
   0x2   :  { %12 = vst [vmem:[#allocation2] sm:$0x1] %v11_v0 }
   0x3   :  { %v31_v1 = vld [vmem:[%s331_s2] sm:$0xff]  ;;  %v235_v3 = vmov 0   ;;  %v32_v4 = vld [vmem:[%s331_s2 + $0x8] sm:$0xff] }
   0x4   :  { %v27_v2 = vld [vmem:[%s330_s1] sm:$0xff]  ;;  %200 = vset.pattern.permute.xlu1 %v235_v3  ;;  %199 = vset.pattern.permute.xlu0 %v235_v3  ;;  %v28_v5 = vld [vmem:[%s330_s1 + $0x8] sm:$0xff] }
   0x5   :  { %69 = vperm.xlu1 %200, %v31_v1   ;;  %41 = vperm.xlu0 %199, %v27_v2  }
   0x9   :  { %74 = vperm.xlu1 %200, %v32_v4   ;;  %46 = vperm.xlu0 %199, %v28_v5  }
   0xa   :  { %13 = vsyncpa [#allocation4], 0  ;;  %v33_v6 = vld [vmem:[%s331_s2 + $0x10] sm:$0xff]  ;;  %v34_v8 = vld [vmem:[%s331_s2 + $0x18] sm:$0xff]  ;;  %v59_v19 = vlaneseq }
   0xb   :  { %v29_v7 = vld [vmem:[%s330_s1 + $0x10] sm:$0xff]  ;;  %v30_v9 = vld [vmem:[%s330_s1 + $0x18] sm:$0xff]  ;;  %v36_v10 = vld [vmem:[%s332_s3 + $0x8] sm:$0xff] }
   0xc   :  { %v35_v11 = vld [vmem:[%s332_s3] sm:$0xff]  ;;  %v38_v12 = vld [vmem:[%s332_s3 + $0x18] sm:$0xff]  ;;  %v37_v13 = vld [vmem:[%s332_s3 + $0x10] sm:$0xff]  ;;  %v60_v20 = vshrl.u32 %v59_v19, 7 }
   0xd   :  { %79 = vperm.xlu1 %200, %v33_v6   ;;  %51 = vperm.xlu0 %199, %v29_v7   ;;  %v128_v14 = vld [vmem:[%s333_s4 + $0x8] sm:$0xff]  ;;  %v127_v15 = vld [vmem:[%s333_s4] sm:$0xff]  ;;  %v130_v16 = vld [vmem:[%s333_s4 + $0x18] sm:$0xff] }
   0xe   :  { %v129_v17 = vld [vmem:[%s333_s4 + $0x10] sm:$0xff]  ;;  %v164_v18 = vld [vmem:[#allocation2] sm:$0x1]  ;;  %v89_v23 = vsub.s32 1, %v60_v20  ;;  %v61_v24 = vsub.s32 0, %v60_v20 }
   0xf   :  { %v26_v25 = vld [vmem:[%s329_s0] sm:$0x3]  ;;  %s236_s0 = smov [#allocation3]  }
  0x10   :  { %v90_v28 = vrot.slane %v26_v25, %v89_v23  ;;  %v62_v29 = vrot.slane %v26_v25, %v61_v24  ;;  %s188_s4 = sshll.u32 %s236_s0, 4  ;;  %s189_s4 = int_to_ptr.vmem [resolvable:$true] %s188_s4 }
  0x11   :  { %84 = vperm.xlu1 %200, %v34_v8   ;;  %56 = vperm.xlu0 %199, %v30_v9   ;;  %s213_s29 = scalar_lea.vmem %s189_s4, 16  ;;  %s217_s5 = scalar_lea.vmem %s189_s4, 32 }
  0x12   :  { %p214_p0 = scmp.ne.s32.totalorder %s189_s4, %s213_s29  ;;  %p218_p1 = scmp.lt.s32.totalorder %s189_s4, %s189_s4 }
  0x13   :  { %p219_p2 = scmp.lt.s32.totalorder %s217_s5, %s213_s29 }
  0x15   :  { %106 = vperm.xlu1 %200, %v36_v10   ;;  %101 = vperm.xlu0 %199, %v35_v11   ;;  %p220_p3 = por %p219_p2, %p218_p1 }
  0x17   :  { %p221_p4 = pnand %p220_p3, %p214_p0 }
  0x19   :  { %116 = vperm.xlu1 %200, %v38_v12   ;;  %111 = vperm.xlu0 %199, %v37_v13  }
  0x1d   :  { %138 = vperm.xlu1 %200, %v128_v14   ;;  %133 = vperm.xlu0 %199, %v127_v15  }
  0x21   :  { %148 = vperm.xlu1 %200, %v130_v16   ;;  %143 = vperm.xlu0 %199, %v129_v17  }
  0x25   :  { %167 = vperm.xlu0 %199, %v164_v18  }
  0x80   :  { %v70_v21 = vpop.permute.xlu1 %69  ;;  %v42_v22 = vpop.permute.xlu0 %41 }
  0x81   :  { %v91_v32 = vmul.f32 %v90_v28, %v70_v21  ;;  %v63_v33 = vmul.f32 %v62_v29, %v42_v22 }
  0x83   :  { %v95_v39 = vadd.f32 %v91_v32, %v63_v33 }
  0x84   :  { %v75_v26 = vpop.permute.xlu1 %74  ;;  %v47_v27 = vpop.permute.xlu0 %46 }
  0x85   :  { %v92_v34 = vmul.f32 %v90_v28, %v75_v26  ;;  %v64_v35 = vmul.f32 %v62_v29, %v47_v27 }
  0x87   :  { %v96_v38 = vadd.f32 %v92_v34, %v64_v35 }
  0x88   :  { %v80_v30 = vpop.permute.xlu1 %79  ;;  %v52_v31 = vpop.permute.xlu0 %51 }
  0x89   :  { %v93_v40 = vmul.f32 %v90_v28, %v80_v30  ;;  %v65_v41 = vmul.f32 %v62_v29, %v52_v31 }
  0x8b   :  { %v97_v49 = vadd.f32 %v93_v40, %v65_v41 }
  0x8c   :  { %v85_v36 = vpop.permute.xlu1 %84  ;;  %v57_v37 = vpop.permute.xlu0 %56 }
  0x8d   :  { %v94_v42 = vmul.f32 %v90_v28, %v85_v36  ;;  %v66_v43 = vmul.f32 %v62_v29, %v57_v37 }
  0x8f   :  { %v98_v48 = vadd.f32 %v94_v42, %v66_v43 }
  0x90   :  { %v107_v44 = vpop.permute.xlu1 %106  ;;  %v102_v45 = vpop.permute.xlu0 %101 }
  0x91   :  { %v120_v46 = vadd.f32 %v107_v44, %v96_v38  ;;  %v119_v47 = vadd.f32 %v102_v45, %v95_v39 }
  0x93   :  { %201 = vtanh.f32 %v120_v46 }
  0x94   :  { %203 = vtanh.f32 %v119_v47  ;;  %v117_v50 = vpop.permute.xlu1 %116  ;;  %v112_v51 = vpop.permute.xlu0 %111 }
  0x95   :  { %v122_v52 = vadd.f32 %v117_v50, %v98_v48  ;;  %v121_v53 = vadd.f32 %v112_v51, %v97_v49 }
  0x97   :  { %205 = vtanh.f32 %v122_v52 }
  0x98   :  { %207 = vtanh.f32 %v121_v53  ;;  %v134_v54 = vpop.permute.xlu0 %133  ;;  %v139_v57 = vpop.permute.xlu1 %138 }
  0x9c   :  { %v144_v62 = vpop.permute.xlu0 %143  ;;  %v149_v1 = vpop.permute.xlu1 %148 }
  0xa0   :  { %v202_v55 = vpop.eup %201  ;;  %v168_v9 = vpop.permute.xlu0 %167 }
  0xa1   :  { %v204_v56 = vpop.eup %203  ;;  %v152_v58 = vmul.f32 %v202_v55, %v139_v57  ;;  %v173_v12 = vrot.slane %v168_v9, %v61_v24 }
  0xa2   :  { %v151_v59 = vmul.f32 %v204_v56, %v134_v54 }
  0xa4   :  { %v206_v60 = vpop.eup %205  ;;  %v155_v63 = vadd.f32 %v152_v58, %v151_v59 }
  0xa5   :  { %v208_v61 = vpop.eup %207  ;;  %v154_v2 = vmul.f32 %v206_v60, %v149_v1 }
  0xa6   :  { %v153_v0 = vmul.f32 %v208_v61, %v144_v62 }
  0xa8   :  { %v156_v3 = vadd.f32 %v155_v63, %v153_v0 }
  0xaa   :  { %v157_v4 = vadd.f32 %v156_v3, %v154_v2 }
  0xac   :  { %v158_v5 = vrot.slane %v157_v4, 4 }
  0xae   :  { %v159_v6 = vadd.f32 %v158_v5, %v157_v4 }
  0xb0   :  { %v160_v7 = vrot.slane %v159_v6, 2 }
  0xb2   :  { %v161_v8 = vadd.f32 %v160_v7, %v159_v6 }
  0xb4   :  { %v162_v10 = vrot.slane %v161_v8, 1 }
  0xb6   :  { %v163_v11 = vadd.f32 %v162_v10, %v161_v8 }
  0xb8   :  { %v174_v13 = vadd.f32 %v173_v12, %v163_v11 }
  0xba   :  { %v196_v14 = vmul.f32 -1.442695, %v174_v13 }
  0xbc   :  { %209 = vpow2.f32 %v196_v14 }
  0xc9   :  { %v210_v15 = vpop.eup %209 }
  0xca   :  { %v178_v16 = vadd.f32 1.0, %v210_v15 }
  0xcc   :  { %211 = vrcp.f32 %v178_v16 }
  0xd9   :  { %v212_v17 = vpop.eup %211 }
  0xda   :  { %181 = vst [vmem:[#allocation3] sm:$0x1] %v212_v17 }
  0xdb   :  { %224 = shalt.err (!%p221_p4)
}
  0xdc   :  { %191 = dma.vmem_to_hbm [thread:$0]  %s189_s4, 16, %s335_s6, [#allocation4]  }
  0xdd   :  { %233 = dma.done.wait [#allocation4], 16  }
  0xde   :  { %234 = vsyncadd [#allocation4], 4294967280 }
  0xdf   :  { %195 = vsyncpa [#allocation4], 1 }

</bundles_post_ra>
